<compile_context>
chip_gen: v6e
topology: v6e:2x2x1
jax: 0.10.0
libtpu: 0.0.40
codegen_flags: <defaults>
</compile_context>

<pallas_src>
import functools

import jax
import jax.numpy as jnp
from jax import lax
from jax.experimental import pallas as pl
from jax.experimental.pallas import tpu as pltpu

NEG_SLOPE = 0.2
EPS = 1e-5


def _make_conv_stats_kernel(KH, KW, Wp, P):
    """Conv as KH*KW shifted matmuls + per-image batch-stat partials."""
    T = KH * KW

    def kernel(x_ref, w_ref, mask_ref, y_ref, sum_ref, ssq_ref):
        # x_ref:    (1, Cin, XC)   bf16  (padded, channel-major, flat spatial)
        # w_ref:    (T, Cout, Cin) bf16
        # mask_ref: (1, P)         f32   (1.0 at valid conv-output positions)
        # y_ref:    (1, Cout, P)   bf16
        # sum_ref / ssq_ref: (1, Cout, 1) f32
        acc = None
        for t in range(T):                        # static unroll over taps
            off = (t // KW) * Wp + (t % KW)       # static flat shift
            xs = x_ref[0, :, off:off + P]         # (Cin, P) bf16, static slice
            d = jnp.dot(w_ref[t], xs, preferred_element_type=jnp.float32)
            acc = d if acc is None else acc + d   # (Cout, P) f32
        y_ref[0] = acc.astype(y_ref.dtype)
        yv = acc * mask_ref[...]                  # zero out pad/garbage columns
        sum_ref[0] = jnp.sum(yv, axis=1, keepdims=True)
        ssq_ref[0] = jnp.sum(yv * yv, axis=1, keepdims=True)

    return kernel


def _bn_act_kernel(y_ref, scale_ref, shift_ref, o_ref):
    # y_ref: (1, Cout, P) bf16; scale/shift: (Cout, 1) f32; o_ref: (1, Cout, P) f32
    z = y_ref[0].astype(jnp.float32) * scale_ref[...] + shift_ref[...]
    o_ref[0] = jnp.where(z >= 0, z, NEG_SLOPE * z)


@functools.partial(jax.jit, static_argnames=("padding", "stride"))
def conv_d_forward(x, w, b, gamma, beta, *, padding, stride=1):
    """x: [N, Cin, H, W] (NCHW). w: [Cout, Cin, KH, KW]. Returns NCHW f32."""
    del b  # conv bias cancels exactly under training-mode BatchNorm
    N, Cin, H, W = x.shape
    Cout, _, KH, KW = w.shape
    sh = sw = stride
    ph = pw = padding
    Hp, Wp = H + 2 * ph, W + 2 * pw
    OH = (Hp - KH) // sh + 1
    OW = (Wp - KW) // sw + 1
    Hv = (OH - 1) * sh + 1          # stride-1 rows actually computed
    P = Hv * Wp                     # flat positions computed per image
    XC = Hp * Wp + KW               # flat x width incl. tail pad for max shift

    # ---- glue: pad + flatten x (bf16), reshape weights (bf16) ----
    x_p = jnp.pad(x.astype(jnp.bfloat16), ((0, 0), (0, 0), (ph, ph), (pw, pw)))
    x_flat = x_p.reshape(N, Cin, Hp * Wp)
    x_flat = jnp.pad(x_flat, ((0, 0), (0, 0), (0, XC - Hp * Wp)))

    w_t = jnp.transpose(w, (2, 3, 0, 1)).reshape(KH * KW, Cout, Cin)
    w_t = w_t.astype(jnp.bfloat16)

    # validity mask over flat stride-1 positions (true conv outputs only)
    r = jnp.arange(P, dtype=jnp.int32)
    rh, rw = r // Wp, r % Wp
    valid = ((rh % sh) == 0) & ((rw % sw) == 0) & ((rw // sw) < OW)
    mask = valid.astype(jnp.float32).reshape(1, P)

    # ---- kernel 1: conv + per-image sum / sum-of-squares ----
    # TODO(synk): for very large H*W or Cin also tile the flat-position axis
    # (needs a halo DMA); one whole image per grid step is plenty here.
    kernel1 = _make_conv_stats_kernel(KH, KW, Wp, P)
    y, psum, pssq = pl.pallas_call(
        kernel1,
        grid=(N,),
        in_specs=[
            pl.BlockSpec((1, Cin, XC), lambda n: (n, 0, 0)),
            pl.BlockSpec((KH * KW, Cout, Cin), lambda n: (0, 0, 0)),
            pl.BlockSpec((1, P), lambda n: (0, 0)),
        ],
        out_specs=[
            pl.BlockSpec((1, Cout, P), lambda n: (n, 0, 0)),
            pl.BlockSpec((1, Cout, 1), lambda n: (n, 0, 0)),
            pl.BlockSpec((1, Cout, 1), lambda n: (n, 0, 0)),
        ],
        out_shape=(
            jax.ShapeDtypeStruct((N, Cout, P), jnp.bfloat16),
            jax.ShapeDtypeStruct((N, Cout, 1), jnp.float32),
            jax.ShapeDtypeStruct((N, Cout, 1), jnp.float32),
        ),
        compiler_params=pltpu.CompilerParams(
            dimension_semantics=("parallel",),
            vmem_limit_bytes=32 * 1024 * 1024,
        ),
    )(x_flat, w_t, mask)

    # ---- BatchNorm2d training-mode statistics (f32, biased variance) ----
    M = N * OH * OW
    mean = jnp.sum(psum, axis=0) / M                       # (Cout, 1)
    var = jnp.sum(pssq, axis=0) / M - mean * mean
    inv_std = lax.rsqrt(var + EPS)
    scale = gamma.reshape(Cout, 1).astype(jnp.float32) * inv_std
    shift = beta.reshape(Cout, 1).astype(jnp.float32) - mean * scale

    # ---- kernel 2: normalize + affine + LeakyReLU (lane-dense layout) ----
    out_flat = pl.pallas_call(
        _bn_act_kernel,
        grid=(N,),
        in_specs=[
            pl.BlockSpec((1, Cout, P), lambda n: (n, 0, 0)),
            pl.BlockSpec((Cout, 1), lambda n: (0, 0)),
            pl.BlockSpec((Cout, 1), lambda n: (0, 0)),
        ],
        out_specs=pl.BlockSpec((1, Cout, P), lambda n: (n, 0, 0)),
        out_shape=jax.ShapeDtypeStruct((N, Cout, P), jnp.float32),
        compiler_params=pltpu.CompilerParams(
            dimension_semantics=("parallel",),
            vmem_limit_bytes=32 * 1024 * 1024,
        ),
    )(y, scale, shift)

    # extract the valid output window; already channel-major NCHW, no transpose
    out = out_flat.reshape(N, Cout, Hv, Wp)[:, :, ::sh, ::sw][:, :, :, :OW]
    return out


def _reference(x, w, b, gamma, beta, padding, stride):
    y = lax.conv_general_dilated(
        x.astype(jnp.float32), w.astype(jnp.float32),
        window_strides=(stride, stride),
        padding=[(padding, padding), (padding, padding)],
        dimension_numbers=("NCHW", "OIHW", "NCHW"),
    ) + b[None, :, None, None]
    mean = y.mean(axis=(0, 2, 3), keepdims=True)
    var = ((y - mean) ** 2).mean(axis=(0, 2, 3), keepdims=True)
    z = (y - mean) / jnp.sqrt(var + EPS) * gamma[None, :, None, None] \
        + beta[None, :, None, None]
    return jnp.where(z >= 0, z, NEG_SLOPE * z)


if __name__ == "__main__":
    # Conv_D(in_channels=4, out_channels=8, kernel_size=3, padding=1, stride=1)
    # applied to x of shape [2, 4, 16, 16].
    N, Cin, H, W = 2, 4, 16, 16
    Cout, KH, KW = 8, 3, 3
    padding, stride = 1, 1

    key = jax.random.PRNGKey(0)
    kx, kw_, kb = jax.random.split(key, 3)
    x = jax.random.normal(kx, (N, Cin, H, W), dtype=jnp.float32)
    fan_in = Cin * KH * KW
    w = jax.random.normal(kw_, (Cout, Cin, KH, KW), dtype=jnp.float32) * (fan_in ** -0.5)
    b = jax.random.normal(kb, (Cout,), dtype=jnp.float32) * 0.1
    gamma = jnp.ones((Cout,), dtype=jnp.float32)   # PyTorch BatchNorm2d defaults
    beta = jnp.zeros((Cout,), dtype=jnp.float32)

    out = conv_d_forward(x, w, b, gamma, beta, padding=padding, stride=stride)
    out = jax.block_until_ready(out)

    ref = _reference(x, w, b, gamma, beta, padding, stride)
    assert out.shape == ref.shape == (N, Cout, H, W)
    max_err = float(jnp.max(jnp.abs(out - ref)))
    assert max_err < 5e-2, f"max abs error too large: {max_err}"

    print("KERNEL_OK")
</pallas_src>

<mosaic_0001>
module attributes {stable_mosaic.version = 11 : i64} {
  func.func @_bn_act_kernel(%arg0: i32, %arg1: memref<1x8x288xbf16, #tpu.memory_space<vmem>>, %arg2: memref<8x1xf32, #tpu.memory_space<vmem>>, %arg3: memref<8x1xf32, #tpu.memory_space<vmem>>, %arg4: memref<1x8x288xf32, #tpu.memory_space<vmem>>) attributes {dimension_semantics = [#tpu.dimension_semantics<parallel>], iteration_bounds = array<i64: 2>, scalar_prefetch = 0 : i64, scratch_operands = 0 : i64, tpu.core_type = #tpu.core_type<tc>, window_params = [{transform_indices = @transform_0, window_bounds = array<i64: 1, 8, 288>}, {pipeline_mode = #tpu.pipeline_mode<synchronous>, transform_indices = @transform_1, window_bounds = array<i64: 8, 1>}, {pipeline_mode = #tpu.pipeline_mode<synchronous>, transform_indices = @transform_2, window_bounds = array<i64: 8, 1>}, {transform_indices = @transform_3, window_bounds = array<i64: 1, 8, 288>}]} {
    %c0 = arith.constant 0 : index
    %c0_0 = arith.constant 0 : index
    %c0_1 = arith.constant 0 : index
    %0 = vector.load %arg1[%c0, %c0_0, %c0_1] : memref<1x8x288xbf16, #tpu.memory_space<vmem>>, vector<1x8x288xbf16>
    %1 = vector.shape_cast %0 : vector<1x8x288xbf16> to vector<8x288xbf16>
    %2 = arith.extf %1 : vector<8x288xbf16> to vector<8x288xf32>
    %c0_2 = arith.constant 0 : index
    %c0_3 = arith.constant 0 : index
    %3 = vector.load %arg2[%c0_2, %c0_3] : memref<8x1xf32, #tpu.memory_space<vmem>>, vector<8x1xf32>
    %4 = vector.broadcast %3 : vector<8x1xf32> to vector<8x288xf32>
    %5 = arith.mulf %2, %4 : vector<8x288xf32>
    %c0_4 = arith.constant 0 : index
    %c0_5 = arith.constant 0 : index
    %6 = vector.load %arg3[%c0_4, %c0_5] : memref<8x1xf32, #tpu.memory_space<vmem>>, vector<8x1xf32>
    %7 = vector.broadcast %6 : vector<8x1xf32> to vector<8x288xf32>
    %8 = arith.addf %5, %7 : vector<8x288xf32>
    %cst = arith.constant 0.000000e+00 : f32
    %9 = vector.broadcast %cst : f32 to vector<8x288xf32>
    %10 = arith.cmpf oge, %8, %9 : vector<8x288xf32>
    %cst_6 = arith.constant 2.000000e-01 : f32
    %11 = vector.broadcast %cst_6 : f32 to vector<8x288xf32>
    %12 = arith.mulf %11, %8 : vector<8x288xf32>
    %13 = arith.select %10, %8, %12 : vector<8x288xi1>, vector<8x288xf32>
    %c0_7 = arith.constant 0 : index
    %c0_8 = arith.constant 0 : index
    %c0_9 = arith.constant 0 : index
    %14 = vector.load %arg4[%c0_7, %c0_8, %c0_9] : memref<1x8x288xf32, #tpu.memory_space<vmem>>, vector<1x8x288xf32>
    %15 = vector.shape_cast %14 : vector<1x8x288xf32> to vector<8x288xf32>
    %16 = vector.shape_cast %13 : vector<8x288xf32> to vector<1x8x288xf32>
    tpu.vector_store %arg4[%c0_7, %c0_8, %c0_9], %16 {strides = array<i32>} : memref<1x8x288xf32, #tpu.memory_space<vmem>>, vector<1x8x288xf32>,
    return
  }
  func.func @transform_0(%arg0: i32) -> (i32, i32, i32) {
    %c0_i32 = arith.constant 0 : i32
    %c0_i32_0 = arith.constant 0 : i32
    %c0_i32_1 = arith.constant 0 : i32
    return %arg0, %c0_i32, %c0_i32_0 : i32, i32, i32
  }
  func.func @transform_1(%arg0: i32) -> (i32, i32) {
    %c0_i32 = arith.constant 0 : i32
    %c0_i32_0 = arith.constant 0 : i32
    %c0_i32_1 = arith.constant 0 : i32
    return %c0_i32, %c0_i32_0 : i32, i32
  }
  func.func @transform_2(%arg0: i32) -> (i32, i32) {
    %c0_i32 = arith.constant 0 : i32
    %c0_i32_0 = arith.constant 0 : i32
    %c0_i32_1 = arith.constant 0 : i32
    return %c0_i32, %c0_i32_0 : i32, i32
  }
  func.func @transform_3(%arg0: i32) -> (i32, i32, i32) {
    %c0_i32 = arith.constant 0 : i32
    %c0_i32_0 = arith.constant 0 : i32
    %c0_i32_1 = arith.constant 0 : i32
    return %arg0, %c0_i32, %c0_i32_0 : i32, i32, i32
  }
}

module attributes {stable_mosaic.version = 11 : i64} {
  func.func @kernel(%arg0: i32, %arg1: memref<1x4x327xbf16, #tpu.memory_space<vmem>>, %arg2: memref<9x8x4xbf16, #tpu.memory_space<vmem>>, %arg3: memref<1x288xf32, #tpu.memory_space<vmem>>, %arg4: memref<1x8x288xbf16, #tpu.memory_space<vmem>>, %arg5: memref<1x8x1xf32, #tpu.memory_space<vmem>>, %arg6: memref<1x8x1xf32, #tpu.memory_space<vmem>>) attributes {dimension_semantics = [#tpu.dimension_semantics<parallel>], iteration_bounds = array<i64: 2>, scalar_prefetch = 0 : i64, scratch_operands = 0 : i64, tpu.core_type = #tpu.core_type<tc>, window_params = [{transform_indices = @transform_0, window_bounds = array<i64: 1, 4, 327>}, {pipeline_mode = #tpu.pipeline_mode<synchronous>, transform_indices = @transform_1, window_bounds = array<i64: 9, 8, 4>}, {pipeline_mode = #tpu.pipeline_mode<synchronous>, transform_indices = @transform_2, window_bounds = array<i64: 1, 288>}, {transform_indices = @transform_3, window_bounds = array<i64: 1, 8, 288>}, {transform_indices = @transform_4, window_bounds = array<i64: 1, 8, 1>}, {transform_indices = @transform_5, window_bounds = array<i64: 1, 8, 1>}]} {
    %c0 = arith.constant 0 : index
    %c0_0 = arith.constant 0 : index
    %c0_1 = arith.constant 0 : index
    %0 = vector.load %arg1[%c0, %c0_0, %c0_1] : memref<1x4x327xbf16, #tpu.memory_space<vmem>>, vector<1x4x288xbf16>
    %1 = vector.shape_cast %0 : vector<1x4x288xbf16> to vector<4x288xbf16>
    %c0_2 = arith.constant 0 : index
    %c0_3 = arith.constant 0 : index
    %c0_4 = arith.constant 0 : index
    %2 = vector.load %arg2[%c0_2, %c0_3, %c0_4] : memref<9x8x4xbf16, #tpu.memory_space<vmem>>, vector<1x8x4xbf16>
    %3 = vector.shape_cast %2 : vector<1x8x4xbf16> to vector<8x4xbf16>
    %cst = arith.constant dense<0.000000e+00> : vector<8x288xf32>
    %4 = tpu.matmul %3, %1, %cst {dimension_numbers = #tpu.dot_dimension_numbers<[1], [0], [0], [1], [0, 0, 1, 1], [], []>} : vector<8x4xbf16>, vector<4x288xbf16>, vector<8x288xf32> -> vector<8x288xf32>
    %c0_5 = arith.constant 0 : index
    %c0_6 = arith.constant 0 : index
    %c1 = arith.constant 1 : index
    %5 = vector.load %arg1[%c0_5, %c0_6, %c1] : memref<1x4x327xbf16, #tpu.memory_space<vmem>>, vector<1x4x288xbf16>
    %6 = vector.shape_cast %5 : vector<1x4x288xbf16> to vector<4x288xbf16>
    %c1_7 = arith.constant 1 : index
    %c0_8 = arith.constant 0 : index
    %c0_9 = arith.constant 0 : index
    %7 = vector.load %arg2[%c1_7, %c0_8, %c0_9] : memref<9x8x4xbf16, #tpu.memory_space<vmem>>, vector<1x8x4xbf16>
    %8 = vector.shape_cast %7 : vector<1x8x4xbf16> to vector<8x4xbf16>
    %cst_10 = arith.constant dense<0.000000e+00> : vector<8x288xf32>
    %9 = tpu.matmul %8, %6, %cst_10 {dimension_numbers = #tpu.dot_dimension_numbers<[1], [0], [0], [1], [0, 0, 1, 1], [], []>} : vector<8x4xbf16>, vector<4x288xbf16>, vector<8x288xf32> -> vector<8x288xf32>
    %10 = arith.addf %4, %9 : vector<8x288xf32>
    %c0_11 = arith.constant 0 : index
    %c0_12 = arith.constant 0 : index
    %c2 = arith.constant 2 : index
    %11 = vector.load %arg1[%c0_11, %c0_12, %c2] : memref<1x4x327xbf16, #tpu.memory_space<vmem>>, vector<1x4x288xbf16>
    %12 = vector.shape_cast %11 : vector<1x4x288xbf16> to vector<4x288xbf16>
    %c2_13 = arith.constant 2 : index
    %c0_14 = arith.constant 0 : index
    %c0_15 = arith.constant 0 : index
    %13 = vector.load %arg2[%c2_13, %c0_14, %c0_15] : memref<9x8x4xbf16, #tpu.memory_space<vmem>>, vector<1x8x4xbf16>
    %14 = vector.shape_cast %13 : vector<1x8x4xbf16> to vector<8x4xbf16>
    %cst_16 = arith.constant dense<0.000000e+00> : vector<8x288xf32>
    %15 = tpu.matmul %14, %12, %cst_16 {dimension_numbers = #tpu.dot_dimension_numbers<[1], [0], [0], [1], [0, 0, 1, 1], [], []>} : vector<8x4xbf16>, vector<4x288xbf16>, vector<8x288xf32> -> vector<8x288xf32>
    %16 = arith.addf %10, %15 : vector<8x288xf32>
    %c0_17 = arith.constant 0 : index
    %c0_18 = arith.constant 0 : index
    %c18 = arith.constant 18 : index
    %17 = vector.load %arg1[%c0_17, %c0_18, %c18] : memref<1x4x327xbf16, #tpu.memory_space<vmem>>, vector<1x4x288xbf16>
    %18 = vector.shape_cast %17 : vector<1x4x288xbf16> to vector<4x288xbf16>
    %c3 = arith.constant 3 : index
    %c0_19 = arith.constant 0 : index
    %c0_20 = arith.constant 0 : index
    %19 = vector.load %arg2[%c3, %c0_19, %c0_20] : memref<9x8x4xbf16, #tpu.memory_space<vmem>>, vector<1x8x4xbf16>
    %20 = vector.shape_cast %19 : vector<1x8x4xbf16> to vector<8x4xbf16>
    %cst_21 = arith.constant dense<0.000000e+00> : vector<8x288xf32>
    %21 = tpu.matmul %20, %18, %cst_21 {dimension_numbers = #tpu.dot_dimension_numbers<[1], [0], [0], [1], [0, 0, 1, 1], [], []>} : vector<8x4xbf16>, vector<4x288xbf16>, vector<8x288xf32> -> vector<8x288xf32>
    %22 = arith.addf %16, %21 : vector<8x288xf32>
    %c0_22 = arith.constant 0 : index
    %c0_23 = arith.constant 0 : index
    %c19 = arith.constant 19 : index
    %23 = vector.load %arg1[%c0_22, %c0_23, %c19] : memref<1x4x327xbf16, #tpu.memory_space<vmem>>, vector<1x4x288xbf16>
    %24 = vector.shape_cast %23 : vector<1x4x288xbf16> to vector<4x288xbf16>
    %c4 = arith.constant 4 : index
    %c0_24 = arith.constant 0 : index
    %c0_25 = arith.constant 0 : index
    %25 = vector.load %arg2[%c4, %c0_24, %c0_25] : memref<9x8x4xbf16, #tpu.memory_space<vmem>>, vector<1x8x4xbf16>
    %26 = vector.shape_cast %25 : vector<1x8x4xbf16> to vector<8x4xbf16>
    %cst_26 = arith.constant dense<0.000000e+00> : vector<8x288xf32>
    %27 = tpu.matmul %26, %24, %cst_26 {dimension_numbers = #tpu.dot_dimension_numbers<[1], [0], [0], [1], [0, 0, 1, 1], [], []>} : vector<8x4xbf16>, vector<4x288xbf16>, vector<8x288xf32> -> vector<8x288xf32>
    %28 = arith.addf %22, %27 : vector<8x288xf32>
    %c0_27 = arith.constant 0 : index
    %c0_28 = arith.constant 0 : index
    %c20 = arith.constant 20 : index
    %29 = vector.load %arg1[%c0_27, %c0_28, %c20] : memref<1x4x327xbf16, #tpu.memory_space<vmem>>, vector<1x4x288xbf16>
    %30 = vector.shape_cast %29 : vector<1x4x288xbf16> to vector<4x288xbf16>
    %c5 = arith.constant 5 : index
    %c0_29 = arith.constant 0 : index
    %c0_30 = arith.constant 0 : index
    %31 = vector.load %arg2[%c5, %c0_29, %c0_30] : memref<9x8x4xbf16, #tpu.memory_space<vmem>>, vector<1x8x4xbf16>
    %32 = vector.shape_cast %31 : vector<1x8x4xbf16> to vector<8x4xbf16>
    %cst_31 = arith.constant dense<0.000000e+00> : vector<8x288xf32>
    %33 = tpu.matmul %32, %30, %cst_31 {dimension_numbers = #tpu.dot_dimension_numbers<[1], [0], [0], [1], [0, 0, 1, 1], [], []>} : vector<8x4xbf16>, vector<4x288xbf16>, vector<8x288xf32> -> vector<8x288xf32>
    %34 = arith.addf %28, %33 : vector<8x288xf32>
    %c0_32 = arith.constant 0 : index
    %c0_33 = arith.constant 0 : index
    %c36 = arith.constant 36 : index
    %35 = vector.load %arg1[%c0_32, %c0_33, %c36] : memref<1x4x327xbf16, #tpu.memory_space<vmem>>, vector<1x4x288xbf16>
    %36 = vector.shape_cast %35 : vector<1x4x288xbf16> to vector<4x288xbf16>
    %c6 = arith.constant 6 : index
    %c0_34 = arith.constant 0 : index
    %c0_35 = arith.constant 0 : index
    %37 = vector.load %arg2[%c6, %c0_34, %c0_35] : memref<9x8x4xbf16, #tpu.memory_space<vmem>>, vector<1x8x4xbf16>
    %38 = vector.shape_cast %37 : vector<1x8x4xbf16> to vector<8x4xbf16>
    %cst_36 = arith.constant dense<0.000000e+00> : vector<8x288xf32>
    %39 = tpu.matmul %38, %36, %cst_36 {dimension_numbers = #tpu.dot_dimension_numbers<[1], [0], [0], [1], [0, 0, 1, 1], [], []>} : vector<8x4xbf16>, vector<4x288xbf16>, vector<8x288xf32> -> vector<8x288xf32>
    %40 = arith.addf %34, %39 : vector<8x288xf32>
    %c0_37 = arith.constant 0 : index
    %c0_38 = arith.constant 0 : index
    %c37 = arith.constant 37 : index
    %41 = vector.load %arg1[%c0_37, %c0_38, %c37] : memref<1x4x327xbf16, #tpu.memory_space<vmem>>, vector<1x4x288xbf16>
    %42 = vector.shape_cast %41 : vector<1x4x288xbf16> to vector<4x288xbf16>
    %c7 = arith.constant 7 : index
    %c0_39 = arith.constant 0 : index
    %c0_40 = arith.constant 0 : index
    %43 = vector.load %arg2[%c7, %c0_39, %c0_40] : memref<9x8x4xbf16, #tpu.memory_space<vmem>>, vector<1x8x4xbf16>
    %44 = vector.shape_cast %43 : vector<1x8x4xbf16> to vector<8x4xbf16>
    %cst_41 = arith.constant dense<0.000000e+00> : vector<8x288xf32>
    %45 = tpu.matmul %44, %42, %cst_41 {dimension_numbers = #tpu.dot_dimension_numbers<[1], [0], [0], [1], [0, 0, 1, 1], [], []>} : vector<8x4xbf16>, vector<4x288xbf16>, vector<8x288xf32> -> vector<8x288xf32>
    %46 = arith.addf %40, %45 : vector<8x288xf32>
    %c0_42 = arith.constant 0 : index
    %c0_43 = arith.constant 0 : index
    %c38 = arith.constant 38 : index
    %47 = vector.load %arg1[%c0_42, %c0_43, %c38] : memref<1x4x327xbf16, #tpu.memory_space<vmem>>, vector<1x4x288xbf16>
    %48 = vector.shape_cast %47 : vector<1x4x288xbf16> to vector<4x288xbf16>
    %c8 = arith.constant 8 : index
    %c0_44 = arith.constant 0 : index
    %c0_45 = arith.constant 0 : index
    %49 = vector.load %arg2[%c8, %c0_44, %c0_45] : memref<9x8x4xbf16, #tpu.memory_space<vmem>>, vector<1x8x4xbf16>
    %50 = vector.shape_cast %49 : vector<1x8x4xbf16> to vector<8x4xbf16>
    %cst_46 = arith.constant dense<0.000000e+00> : vector<8x288xf32>
    %51 = tpu.matmul %50, %48, %cst_46 {dimension_numbers = #tpu.dot_dimension_numbers<[1], [0], [0], [1], [0, 0, 1, 1], [], []>} : vector<8x4xbf16>, vector<4x288xbf16>, vector<8x288xf32> -> vector<8x288xf32>
    %52 = arith.addf %46, %51 : vector<8x288xf32>
    %53 = arith.truncf %52 : vector<8x288xf32> to vector<8x288xbf16>
    %c0_47 = arith.constant 0 : index
    %c0_48 = arith.constant 0 : index
    %c0_49 = arith.constant 0 : index
    %54 = vector.load %arg4[%c0_47, %c0_48, %c0_49] : memref<1x8x288xbf16, #tpu.memory_space<vmem>>, vector<1x8x288xbf16>
    %55 = vector.shape_cast %54 : vector<1x8x288xbf16> to vector<8x288xbf16>
    %56 = vector.shape_cast %53 : vector<8x288xbf16> to vector<1x8x288xbf16>
    tpu.vector_store %arg4[%c0_47, %c0_48, %c0_49], %56 {strides = array<i32>} : memref<1x8x288xbf16, #tpu.memory_space<vmem>>, vector<1x8x288xbf16>,
    %c0_50 = arith.constant 0 : index
    %c0_51 = arith.constant 0 : index
    %57 = vector.load %arg3[%c0_50, %c0_51] : memref<1x288xf32, #tpu.memory_space<vmem>>, vector<1x288xf32>
    %58 = vector.broadcast %57 : vector<1x288xf32> to vector<8x288xf32>
    %59 = arith.mulf %52, %58 : vector<8x288xf32>
    %cst_52 = arith.constant dense<0.000000e+00> : vector<8xf32>
    %60 = vector.multi_reduction <add>, %59, %cst_52 [1] : vector<8x288xf32> to vector<8xf32>
    %61 = vector.shape_cast %60 : vector<8xf32> to vector<8x1xf32>
    %c0_53 = arith.constant 0 : index
    %c0_54 = arith.constant 0 : index
    %c0_55 = arith.constant 0 : index
    %62 = vector.load %arg5[%c0_53, %c0_54, %c0_55] : memref<1x8x1xf32, #tpu.memory_space<vmem>>, vector<1x8x1xf32>
    %63 = vector.shape_cast %62 : vector<1x8x1xf32> to vector<8x1xf32>
    %64 = vector.shape_cast %61 : vector<8x1xf32> to vector<1x8x1xf32>
    tpu.vector_store %arg5[%c0_53, %c0_54, %c0_55], %64 {strides = array<i32>} : memref<1x8x1xf32, #tpu.memory_space<vmem>>, vector<1x8x1xf32>,
    %65 = arith.mulf %59, %59 : vector<8x288xf32>
    %cst_56 = arith.constant dense<0.000000e+00> : vector<8xf32>
    %66 = vector.multi_reduction <add>, %65, %cst_56 [1] : vector<8x288xf32> to vector<8xf32>
    %67 = vector.shape_cast %66 : vector<8xf32> to vector<8x1xf32>
    %c0_57 = arith.constant 0 : index
    %c0_58 = arith.constant 0 : index
    %c0_59 = arith.constant 0 : index
    %68 = vector.load %arg6[%c0_57, %c0_58, %c0_59] : memref<1x8x1xf32, #tpu.memory_space<vmem>>, vector<1x8x1xf32>
    %69 = vector.shape_cast %68 : vector<1x8x1xf32> to vector<8x1xf32>
    %70 = vector.shape_cast %67 : vector<8x1xf32> to vector<1x8x1xf32>
    tpu.vector_store %arg6[%c0_57, %c0_58, %c0_59], %70 {strides = array<i32>} : memref<1x8x1xf32, #tpu.memory_space<vmem>>, vector<1x8x1xf32>,
    return
  }
  func.func @transform_0(%arg0: i32) -> (i32, i32, i32) {
    %c0_i32 = arith.constant 0 : i32
    %c0_i32_0 = arith.constant 0 : i32
    %c0_i32_1 = arith.constant 0 : i32
    return %arg0, %c0_i32, %c0_i32_0 : i32, i32, i32
  }
  func.func @transform_1(%arg0: i32) -> (i32, i32, i32) {
    %c0_i32 = arith.constant 0 : i32
    %c0_i32_0 = arith.constant 0 : i32
    %c0_i32_1 = arith.constant 0 : i32
    %c0_i32_2 = arith.constant 0 : i32
    return %c0_i32, %c0_i32_0, %c0_i32_1 : i32, i32, i32
  }
  func.func @transform_2(%arg0: i32) -> (i32, i32) {
    %c0_i32 = arith.constant 0 : i32
    %c0_i32_0 = arith.constant 0 : i32
    %c0_i32_1 = arith.constant 0 : i32
    return %c0_i32, %c0_i32_0 : i32, i32
  }
  func.func @transform_3(%arg0: i32) -> (i32, i32, i32) {
    %c0_i32 = arith.constant 0 : i32
    %c0_i32_0 = arith.constant 0 : i32
    %c0_i32_1 = arith.constant 0 : i32
    return %arg0, %c0_i32, %c0_i32_0 : i32, i32, i32
  }
  func.func @transform_4(%arg0: i32) -> (i32, i32, i32) {
    %c0_i32 = arith.constant 0 : i32
    %c0_i32_0 = arith.constant 0 : i32
    %c0_i32_1 = arith.constant 0 : i32
    return %arg0, %c0_i32, %c0_i32_0 : i32, i32, i32
  }
  func.func @transform_5(%arg0: i32) -> (i32, i32, i32) {
    %c0_i32 = arith.constant 0 : i32
    %c0_i32_0 = arith.constant 0 : i32
    %c0_i32_1 = arith.constant 0 : i32
    return %arg0, %c0_i32, %c0_i32_0 : i32, i32, i32
  }
}

</mosaic_0001>

<bundles_post_ra>
// kernel: conv_d_forward.3
= control target key start
LH: loop header
LB: loop body
LE: loop exit
PB: predicated region body
PF: predicated region fallthrough
CT: control target
= control target key end

     0   :  { %s312_s12 = smov 0   ;;  %s335_s0 = inlined_call_operand.vmem [shape: bf16[2,8,288], index: 0, kind: input, shape index: {}]   ;;  %s336_s1 = inlined_call_operand.vmem [shape: f32[8,1], index: 1, kind: input, shape index: {}]   ;;  %s337_s2 = inlined_call_operand.vmem [shape: f32[8,1], index: 2, kind: input, shape index: {}]   ;;  %s338_s3 = inlined_call_operand.vmem [shape: f32[2,8,288], index: 3, kind: output, shape index: {}]  }
   0x1 LB: > { %s262_s13 = sadd.s32 4294967295, %s289_s12   ;;  %p266_p0 = scmp.ge.s32.totalorder %s289_s12, 1  ;;  %s289_s12 = sphi %s312_s12, %s13_s12  }
   0x2   : > { %p137_p1 = scmp.lt.s32.totalorder %s289_s12, 3 }
   0x4   : > { %p138_p2 = pnand %p266_p0, %p137_p1 }
   0x5   : > { %p161_p3 = scmp.lt.s32.totalorder (!%p138_p2), %s262_s13, 1 }
   0x6   : > { %141 = sbr.rel (%p138_p2) target bundleno = 148 (0x94), region = 32 }
   0xb   : > { %v176_v0 = vld [vmem:[%s336_s1] sm:$0xff]  ;;  %v291_v1 = vmov 0   ;;  %s340_s13 = smov (!%p161_p3, %s262_s13), 1  ;;  %vm205_vm3 = vcmask 261120  }
   0xc   : > { %282 = vset.pattern.permute.xlu0 %v291_v1  ;;  %v185_v2 = vld [vmem:[%s337_s2] sm:$0xff]  ;;  %s271_s18 = smul.u32 12, %s340_s13 }
   0xd   : > { %179 = vperm.xlu0 %282, %v176_v0   ;;  %s272_s22 = smul.u32 24, %s340_s13 }
   0xe   : > { %s165_s21 = scalar_lea.vmem %s335_s0, %s271_s18 }
   0xf   : > { %v171_v3 = vld [vmem:[%s165_s21] sm:$0xff]  ;;  %v172_v4 = vld [vmem:[%s165_s21 + $0x8] sm:$0xf]  ;;  %s170_s25 = scalar_lea.vmem %s338_s3, %s272_s22 }
  0x10   : > { %v173_v5 = vunpack.c.l.bf16 %v171_v3  ;;  %v174_v6 = vunpack.c.h.bf16 %v171_v3  ;;  %v175_v7 = vunpack.c.l.bf16 %v172_v4 }
  0x11   : > { %188 = vperm.xlu0 %282, %v185_v2  }
  0x88   : > { %v180_v8 = vpop.permute.xlu0 %179 }
  0x89   : > { %v182_v9 = vmul.f32 %v180_v8, %v173_v5  ;;  %v183_v10 = vmul.f32 %v180_v8, %v174_v6  ;;  %v184_v11 = vmul.f32 %v180_v8, %v175_v7 }
  0x8c   : > { %v189_v12 = vpop.permute.xlu0 %188 }
  0x8d   : > { %v191_v13 = vadd.f32 %v189_v12, %v182_v9  ;;  %v192_v14 = vadd.f32 %v189_v12, %v183_v10  ;;  %v193_v15 = vadd.f32 %v189_v12, %v184_v11 }
  0x8f   : > { %vm194_vm0 = vcmp.ge.f32.partialorder %v191_v13, 0.0  ;;  %vm195_vm1 = vcmp.ge.f32.partialorder %v192_v14, 0.0  ;;  %vm196_vm2 = vcmp.ge.f32.partialorder %v193_v15, 0.0  ;;  %v197_v16 = vmul.f32 0.2, %v191_v13 }
  0x90   : > { %v198_v17 = vmul.f32 0.2, %v192_v14  ;;  %v199_v18 = vmul.f32 0.2, %v193_v15 }
  0x91   : > { %v200_v19 = vsel %vm194_vm0, %v191_v13, %v197_v16 }
  0x92   : > { %v201_v20 = vsel %vm195_vm1, %v192_v14, %v198_v17  ;;  %v202_v21 = vsel %vm196_vm2, %v193_v15, %v199_v18  ;;  %203 = vst [vmem:[%s170_s25] sm:$0xff] %v200_v19 }
  0x93   : > { %204 = vst [vmem:[%s170_s25 + $0x8] sm:$0xff] %v201_v20  ;;  %206 = vst.msk [vmem:[%s170_s25 + $0x10] sm:$0xff] %vm205_vm3, %v202_v21 }
  0x94 PF: > { %s13_s12 = sadd.s32 1, %s289_s12  }
  0x95   : > { %p10_p4 = scmp.ge.s32.totalorder %s13_s12, 4  }
  0x97   :  { %12 = sbr.rel (!%p10_p4) target bundleno = 1 (0x1), region = 62 }

// kernel: conv_d_forward.2
= control target key start
LH: loop header
LB: loop body
LE: loop exit
PB: predicated region body
PF: predicated region fallthrough
CT: control target
= control target key end

     0   :  { %s1712_s18 = smov 0   ;;  %s1901_s0 = inlined_call_operand.vmem [shape: bf16[2,4,327], index: 0, kind: input, shape index: {}]   ;;  %s1902_s1 = inlined_call_operand.vmem [shape: bf16[9,8,4], index: 1, kind: input, shape index: {}]   ;;  %s1903_s2 = inlined_call_operand.vmem [shape: f32[1,288], index: 2, kind: input, shape index: {}]   ;;  %s1904_s3 = inlined_call_operand.vmem [shape: bf16[2,8,288], index: 3, kind: output, shape index: {0}]   ;;  %s1905_s4 = inlined_call_operand.vmem [shape: f32[2,8,1], index: 4, kind: output, shape index: {1}]   ;;  %s1906_s5 = inlined_call_operand.vmem [shape: f32[2,8,1], index: 5, kind: output, shape index: {2}]  }
   0x1 LB: > { %s1510_s19 = sadd.s32 4294967295, %s1668_s18   ;;  %p1514_p0 = scmp.ge.s32.totalorder %s1668_s18, 1  ;;  %s1668_s18 = sphi %s1712_s18, %s16_s18  }
   0x2   : > { %p192_p1 = scmp.lt.s32.totalorder %s1668_s18, 3 }
   0x4   : > { %p193_p2 = pnand %p1514_p0, %p192_p1 }
   0x5   : > { %p228_p3 = scmp.lt.s32.totalorder (!%p193_p2), %s1510_s19, 1  ;;  %s1674_s24 = smov (!%p193_p2), 127  }
   0x6   : > { %196 = sbr.rel (%p193_p2) target bundleno = 552 (0x228), region = 32  ;;  %s1675_s25 = smov (!%p193_p2), 126  }
   0x7   : > { %s1676_s26 = smov (!%p193_p2), 110   ;;  %s1677_s27 = smov (!%p193_p2), 109  }
   0x8   : > { %s1678_s28 = smov (!%p193_p2), 108   ;;  %s1679_s29 = smov (!%p193_p2), 92  }
   0x9   : > { %s1680_s30 = smov (!%p193_p2), 91   ;;  %s1681_s6 = smov (!%p193_p2), 90  }
   0xb   : > { %v256_v0 = vlaneseq  ;;  %v1670_v1 = vmov 1983009808   ;;  %v1671_v3 = vmov 0.0   ;;  %s1908_s19 = smov (!%p228_p3, %s1510_s19), 1  ;;  %vm1672_vm0 = vmmov 0  }
   0xc   : > { %v254_v2 = vunpack.c.l.s4 %v1670_v1  ;;  %1578 = vmatprep.subr.bf16.mxu1 %v1671_v3  ;;  %1580 = vmatprep.mubr.msk.bf16.mxu1 %vm1672_vm0, %v1671_v3  ;;  %s1632_s20 = smul.u32 6, %s1908_s19  ;;  %v1673_v6 = vmov 0   ;;  %vm281_vm1 = vcmask 1041408   ;;  %vm274_vm2 = vcmask 1039360   ;;  %v1519_v52 = vld [vmem:[%s1902_s1 + $0x4] sm:$0xf] }
   0xd   : > { %v1723_v4 = vshrl.u32 %v256_v0, 7  ;;  %323 = vmatprep.mubr.bf16.mxu0 %v1673_v6  ;;  %vm277_vm3 = vcmask 31744   ;;  %vm491_vm4 = vcmask 1031168   ;;  %v248_v62 = vld [vmem:[%s1902_s1] sm:$0xf]  ;;  %vm616_vm5 = vcmask 900096  }
   0xe   : > { %v255_v5 = vunpack.c.0.s8 %v254_v2  ;;  %s1735_s23 = scalar_lea.vmem %s1901_s0, %s1632_s20  ;;  %vm741_vm6 = vcmask 891904   ;;  %vm866_vm7 = vcmask 883712   ;;  %vm991_vm8 = vcmask 752640   ;;  %s1517_s8 = sshll.u32 %s1908_s19, 3 }
   0xf   : > { %v247_v8 = vld [vmem:[%s1735_s23] sm:$0x3f]  ;;  %vm1116_vm9 = vcmask 744448   ;;  %vm1241_vm10 = vcmask 736256   ;;  %vm1354_vm11 = vcmask 257024   ;;  %vm1377_vm12 = vcmask 261120   ;;  %s241_s11 = scalar_lea.vmem %s1905_s4, %s1517_s8  ;;  %s245_s14 = scalar_lea.vmem %s1906_s5, %s1517_s8 }
  0x10   : > { %v1730_v7 = vsub.s32 %v255_v5, %v1723_v4  ;;  %v252_v10 = vcombine.high %v247_v8, %v247_v8  ;;  %v465_v11 = vld [vmem:[%s1735_s23] sm:$0x3f]  ;;  %vm1382_vm13 = vcmask 7168  }
  0x11   : > { %v469_v15 = vcombine.high %v465_v11, %v465_v11  ;;  %v590_v17 = vld [vmem:[%s1735_s23] sm:$0x3f] }
  0x12   : > { %v1739_v9 = vrot.slane %v247_v8, %v1730_v7  ;;  %v1744_v12 = vrot.slane %v252_v10, %v1730_v7  ;;  %v476_v14 = vrot.slane %v465_v11, %v1730_v7  ;;  %v601_v19 = vrot.slane %v590_v17, %v1730_v7  ;;  %v715_v22 = vld [vmem:[%s1735_s23] sm:$0x3f]  ;;  %v1526_v10 = vld [vmem:[%s1902_s1 + $0x8] sm:$0xf] }
  0x13   : > { %v483_v18 = vrot.slane %v469_v15, %v1730_v7  ;;  %v594_v20 = vcombine.high %v590_v17, %v590_v17  ;;  %v726_v24 = vrot.slane %v715_v22, %v1730_v7  ;;  %v719_v25 = vcombine.high %v715_v22, %v715_v22  ;;  %v840_v27 = vld [vmem:[%s1735_s23] sm:$0x3f] }
  0x14   : > { %268 = vrot.lane.b32.xlu0 %v1739_v9, %s1674_s24  ;;  %v1748_v13 = vcombine.high %v1739_v9, %v1739_v9  ;;  %272 = vrot.lane.b32.xlu1 %v1744_v12, %s1674_s24  ;;  %v484_v16 = vcombine.high %v476_v14, %v476_v14  ;;  %v609_v21 = vcombine.high %v601_v19, %v601_v19  ;;  %v965_v32 = vld [vmem:[%s1735_s23] sm:$0x3f]  ;;  %v382_v55 = vsel %vm281_vm1, %v1744_v12, 0 }
  0x15   : > { %v608_v23 = vrot.slane %v594_v20, %v1730_v7  ;;  %v734_v26 = vcombine.high %v726_v24, %v726_v24  ;;  %v733_v28 = vrot.slane %v719_v25, %v1730_v7  ;;  %v851_v29 = vrot.slane %v840_v27, %v1730_v7  ;;  %v1090_v37 = vld [vmem:[%s1735_s23] sm:$0x3f] }
  0x16   : > { %v844_v30 = vcombine.high %v840_v27, %v840_v27  ;;  %v976_v34 = vrot.slane %v965_v32, %v1730_v7  ;;  %v969_v35 = vcombine.high %v965_v32, %v965_v32  ;;  %v1101_v39 = vrot.slane %v1090_v37, %v1730_v7  ;;  %v1215_v42 = vld [vmem:[%s1735_s23] sm:$0x3f]  ;;  %v1534_v27 = vld [vmem:[%s1902_s1 + $0x10] sm:$0xf] }
  0x17   : > { %v859_v31 = vcombine.high %v851_v29, %v851_v29  ;;  %v1094_v40 = vcombine.high %v1090_v37, %v1090_v37  ;;  %v1226_v44 = vrot.slane %v1215_v42, %v1730_v7  ;;  %v1219_v45 = vcombine.high %v1215_v42, %v1215_v42  ;;  %v1542_v42 = vld [vmem:[%s1902_s1 + $0x18] sm:$0xf] }
  0x18   : > { %270 = vrot.lane.b32.xlu0 %v1748_v13, %s1674_s24  ;;  %485 = vrot.lane.b32.xlu1 %v476_v14, %s1675_s25  ;;  %v858_v33 = vrot.slane %v844_v30, %v1730_v7  ;;  %v984_v36 = vcombine.high %v976_v34, %v976_v34  ;;  %v983_v38 = vrot.slane %v969_v35, %v1730_v7  ;;  %v376_v58 = vsel %vm281_vm1, %v1739_v9, 0  ;;  %v1538_v35 = vld [vmem:[%s1902_s1 + $0x14] sm:$0xf] }
  0x19   : > { %v1109_v41 = vcombine.high %v1101_v39, %v1101_v39  ;;  %v1108_v43 = vrot.slane %v1094_v40, %v1730_v7  ;;  %v1234_v46 = vcombine.high %v1226_v44, %v1226_v44  ;;  %v1233_v47 = vrot.slane %v1219_v45, %v1730_v7 }
  0x1c   : > { %487 = vrot.lane.b32.xlu0 %v484_v16, %s1675_s25  ;;  %489 = vrot.lane.b32.xlu1 %v483_v18, %s1675_s25 }
  0x20   : > { %610 = vrot.lane.b32.xlu0 %v601_v19, %s1676_s26  ;;  %612 = vrot.lane.b32.xlu1 %v609_v21, %s1676_s26  ;;  %v1530_v19 = vld [vmem:[%s1902_s1 + $0xc] sm:$0xf] }
  0x24   : > { %614 = vrot.lane.b32.xlu0 %v608_v23, %s1676_s26  ;;  %735 = vrot.lane.b32.xlu1 %v726_v24, %s1677_s27 }
  0x28   : > { %737 = vrot.lane.b32.xlu0 %v734_v26, %s1677_s27  ;;  %739 = vrot.lane.b32.xlu1 %v733_v28, %s1677_s27 }
  0x2c   : > { %860 = vrot.lane.b32.xlu0 %v851_v29, %s1678_s28  ;;  %862 = vrot.lane.b32.xlu1 %v859_v31, %s1678_s28 }
  0x30   : > { %864 = vrot.lane.b32.xlu0 %v858_v33, %s1678_s28  ;;  %985 = vrot.lane.b32.xlu1 %v976_v34, %s1679_s29 }
  0x34   : > { %987 = vrot.lane.b32.xlu0 %v984_v36, %s1679_s29  ;;  %989 = vrot.lane.b32.xlu1 %v983_v38, %s1679_s29  ;;  %s1633_s29 = smul.u32 12, %s1908_s19 }
  0x36   : > { %s237_s7 = scalar_lea.vmem %s1904_s3, %s1633_s29 }
  0x38   : > { %1110 = vrot.lane.b32.xlu0 %v1101_v39, %s1680_s30  ;;  %1112 = vrot.lane.b32.xlu1 %v1109_v41, %s1680_s30 }
  0x3c   : > { %1114 = vrot.lane.b32.xlu0 %v1108_v43, %s1680_s30  ;;  %1235 = vrot.lane.b32.xlu1 %v1226_v44, %s1681_s6 }
  0x40   : > { %1237 = vrot.lane.b32.xlu0 %v1234_v46, %s1681_s6  ;;  %1239 = vrot.lane.b32.xlu1 %v1233_v47, %s1681_s6 }
  0x86   : > { %v269_v48 = vpop.permute.xlu0 %268  ;;  %v273_v49 = vpop.permute.xlu1 %272 }
  0x87   : > { %v289_v50 = vsel %vm281_vm1, %v273_v49, 0 }
  0x88   : > { %1579 = vmatpush3.bf16.msra.mxu1 %v289_v50 }
  0x89   : > { %1584 = vmatprep.subr.bf16.mxu1 %v1671_v3 }
  0x8a   : > { %v271_v51 = vpop.permute.xlu0 %270  ;;  %v486_v57 = vpop.permute.xlu1 %485 }
  0x8b   : > { %v276_v53 = vsel %vm274_vm2, %v271_v51, %v273_v49  ;;  %v275_v54 = vsel %vm274_vm2, %v269_v48, %v271_v51  ;;  %1581 = vmatmul.mubr.msk.bf16.vlgmr.msra.gmra.mxu1 %vm277_vm3, %v1519_v52  ;;  %v1546_v49 = vld [vmem:[%s1902_s1 + $0x1c] sm:$0xf] }
  0x8c   : > { %1520 = vmatprep.subr.msk.bf16.mxu0 %vm281_vm1, %v276_v53  ;;  %v283_v56 = vsel %vm281_vm1, %v275_v54, 0  ;;  %1585 = vmatpush3.bf16.msra.mxu1 %v382_v55  ;;  %v1550_v53 = vld [vmem:[%s1902_s1 + $0x20] sm:$0xf] }
  0x8d   : > { %306 = vmatpush1.bf16.msra.mxu0 %v283_v56  ;;  %1586 = vmatprep.mubr.msk.bf16.mxu1 %vm1672_vm0, %v1671_v3 }
  0x8e   : > { %1523 = vmatprep.subr.msk.bf16.mxu0 %vm281_vm1, %v1748_v13  ;;  %v488_v59 = vpop.permute.xlu0 %487  ;;  %1590 = vmatprep.subr.bf16.mxu1 %v1671_v3  ;;  %v490_v60 = vpop.permute.xlu1 %489 }
  0x8f   : > { %v493_v61 = vsel %vm491_vm4, %v488_v59, %v490_v60  ;;  %v492_v0 = vsel %vm491_vm4, %v486_v57, %v488_v59  ;;  %v504_v1 = vsel %vm281_vm1, %v490_v60, 0 }
  0x90   : > { %1521 = vmatmul.mubr.msk.bf16.vlgmr.msra.gmra.mxu0 %vm277_vm3, %v1519_v52  ;;  %v498_v5 = vsel %vm281_vm1, %v492_v0, 0 }
  0x91   : > { %399 = vmatpush1.bf16.msra.mxu0 %v376_v58  ;;  %416 = vmatprep.mubr.bf16.mxu0 %v1673_v6 }
  0x92   : > { %1527 = vmatprep.subr.msk.bf16.mxu0 %vm281_vm1, %v493_v61  ;;  %v611_v63 = vpop.permute.xlu0 %610  ;;  %v613_v2 = vpop.permute.xlu1 %612 }
  0x93   : > { %1587 = vmatmul.mubr.msk.bf16.vlgmr.msra.gmra.mxu1 %vm277_vm3, %v248_v62  ;;  %v617_v12 = vsel %vm616_vm5, %v611_v63, %v613_v2 }
  0x94   : > { %1591 = vmatpush3.bf16.msra.mxu1 %v504_v1  ;;  %1592 = vmatprep.mubr.msk.bf16.mxu1 %vm1672_vm0, %v1671_v3  ;;  %v623_v15 = vsel %vm281_vm1, %v617_v12, 0 }
  0x95   : > { %1596 = vmatprep.subr.bf16.mxu1 %v1671_v3 }
  0x96   : > { %v615_v7 = vpop.permute.xlu0 %614  ;;  %v736_v9 = vpop.permute.xlu1 %735 }
  0x97   : > { %v618_v8 = vsel %vm616_vm5, %v613_v2, %v615_v7  ;;  %v629_v13 = vsel %vm281_vm1, %v615_v7, 0 }
  0x98   : > { %1524 = vmatmul.mubr.msk.bf16.vlgmr.msra.gmra.mxu0 %vm277_vm3, %v248_v62 }
  0x99   : > { %521 = vmatpush1.bf16.msra.mxu0 %v498_v5  ;;  %538 = vmatprep.mubr.bf16.mxu0 %v1673_v6 }
  0x9a   : > { %1531 = vmatprep.subr.msk.bf16.mxu0 %vm281_vm1, %v618_v8  ;;  %v738_v11 = vpop.permute.xlu0 %737  ;;  %v740_v14 = vpop.permute.xlu1 %739 }
  0x9b   : > { %1593 = vmatmul.mubr.msk.bf16.vlgmr.msra.gmra.mxu1 %vm277_vm3, %v1526_v10  ;;  %v743_v17 = vsel %vm741_vm6, %v738_v11, %v740_v14  ;;  %v742_v20 = vsel %vm741_vm6, %v736_v9, %v738_v11  ;;  %v754_v21 = vsel %vm281_vm1, %v740_v14, 0 }
  0x9c   : > { %1597 = vmatpush3.bf16.msra.mxu1 %v629_v13  ;;  %1598 = vmatprep.mubr.msk.bf16.mxu1 %vm1672_vm0, %v1671_v3  ;;  %v748_v23 = vsel %vm281_vm1, %v742_v20, 0 }
  0x9d   : > { %1602 = vmatprep.subr.bf16.mxu1 %v1671_v3 }
  0x9e   : > { %v861_v16 = vpop.permute.xlu0 %860  ;;  %v863_v18 = vpop.permute.xlu1 %862 }
  0x9f   : > { %v867_v28 = vsel %vm866_vm7, %v861_v16, %v863_v18 }
  0xa0   : > { %1528 = vmatmul.mubr.msk.bf16.vlgmr.msra.gmra.mxu0 %vm277_vm3, %v1526_v10  ;;  %v873_v31 = vsel %vm281_vm1, %v867_v28, 0 }
  0xa1   : > { %646 = vmatpush1.bf16.msra.mxu0 %v623_v15  ;;  %663 = vmatprep.mubr.bf16.mxu0 %v1673_v6 }
  0xa2   : > { %1535 = vmatprep.subr.msk.bf16.mxu0 %vm281_vm1, %v743_v17  ;;  %v865_v22 = vpop.permute.xlu0 %864  ;;  %v986_v24 = vpop.permute.xlu1 %985 }
  0xa3   : > { %1599 = vmatmul.mubr.msk.bf16.vlgmr.msra.gmra.mxu1 %vm277_vm3, %v1530_v19  ;;  %v868_v25 = vsel %vm866_vm7, %v863_v18, %v865_v22  ;;  %v879_v29 = vsel %vm281_vm1, %v865_v22, 0 }
  0xa4   : > { %1603 = vmatpush3.bf16.msra.mxu1 %v754_v21  ;;  %1604 = vmatprep.mubr.msk.bf16.mxu1 %vm1672_vm0, %v1671_v3 }
  0xa5   : > { %1608 = vmatprep.subr.bf16.mxu1 %v1671_v3 }
  0xa6   : > { %v988_v26 = vpop.permute.xlu0 %987  ;;  %v990_v30 = vpop.permute.xlu1 %989 }
  0xa7   : > { %v993_v33 = vsel %vm991_vm8, %v988_v26, %v990_v30  ;;  %v992_v36 = vsel %vm991_vm8, %v986_v24, %v988_v26  ;;  %v1004_v37 = vsel %vm281_vm1, %v990_v30, 0 }
  0xa8   : > { %1532 = vmatmul.mubr.msk.bf16.vlgmr.msra.gmra.mxu0 %vm277_vm3, %v1530_v19  ;;  %v998_v39 = vsel %vm281_vm1, %v992_v36, 0 }
  0xa9   : > { %771 = vmatpush1.bf16.msra.mxu0 %v748_v23  ;;  %788 = vmatprep.mubr.bf16.mxu0 %v1673_v6 }
  0xaa   : > { %1539 = vmatprep.subr.msk.bf16.mxu0 %vm281_vm1, %v868_v25  ;;  %v1111_v32 = vpop.permute.xlu0 %1110  ;;  %v1113_v34 = vpop.permute.xlu1 %1112 }
  0xab   : > { %1605 = vmatmul.mubr.msk.bf16.vlgmr.msra.gmra.mxu1 %vm277_vm3, %v1534_v27  ;;  %v1117_v43 = vsel %vm1116_vm9, %v1111_v32, %v1113_v34 }
  0xac   : > { %1609 = vmatpush3.bf16.msra.mxu1 %v879_v29  ;;  %1610 = vmatprep.mubr.msk.bf16.mxu1 %vm1672_vm0, %v1671_v3  ;;  %v1123_v47 = vsel %vm281_vm1, %v1117_v43, 0 }
  0xad   : > { %1614 = vmatprep.subr.bf16.mxu1 %v1671_v3 }
  0xae   : > { %v1115_v38 = vpop.permute.xlu0 %1114  ;;  %v1236_v40 = vpop.permute.xlu1 %1235 }
  0xaf   : > { %v1118_v41 = vsel %vm1116_vm9, %v1113_v34, %v1115_v38  ;;  %v1129_v44 = vsel %vm281_vm1, %v1115_v38, 0 }
  0xb0   : > { %1536 = vmatmul.mubr.msk.bf16.vlgmr.msra.gmra.mxu0 %vm277_vm3, %v1534_v27 }
  0xb1   : > { %896 = vmatpush1.bf16.msra.mxu0 %v873_v31  ;;  %913 = vmatprep.mubr.bf16.mxu0 %v1673_v6 }
  0xb2   : > { %1543 = vmatprep.subr.msk.bf16.mxu0 %vm281_vm1, %v993_v33  ;;  %v1238_v45 = vpop.permute.xlu0 %1237  ;;  %v1240_v46 = vpop.permute.xlu1 %1239 }
  0xb3   : > { %1611 = vmatmul.mubr.msk.bf16.vlgmr.msra.gmra.mxu1 %vm277_vm3, %v1538_v35  ;;  %v1243_v48 = vsel %vm1241_vm10, %v1238_v45, %v1240_v46  ;;  %v1242_v50 = vsel %vm1241_vm10, %v1236_v40, %v1238_v45  ;;  %v1254_v51 = vsel %vm281_vm1, %v1240_v46, 0 }
  0xb4   : > { %1615 = vmatpush3.bf16.msra.mxu1 %v1004_v37  ;;  %1616 = vmatprep.mubr.msk.bf16.mxu1 %vm1672_vm0, %v1671_v3  ;;  %v1248_v52 = vsel %vm281_vm1, %v1242_v50, 0 }
  0xb5   : > { %1620 = vmatprep.subr.bf16.mxu1 %v1671_v3 }
  0xb8   : > { %1540 = vmatmul.mubr.msk.bf16.vlgmr.msra.gmra.mxu0 %vm277_vm3, %v1538_v35 }
  0xb9   : > { %1021 = vmatpush1.bf16.msra.mxu0 %v998_v39  ;;  %1038 = vmatprep.mubr.bf16.mxu0 %v1673_v6 }
  0xba   : > { %1547 = vmatprep.subr.msk.bf16.mxu0 %vm281_vm1, %v1118_v41 }
  0xbb   : > { %1617 = vmatmul.mubr.msk.bf16.vlgmr.msra.gmra.mxu1 %vm277_vm3, %v1542_v42 }
  0xbc   : > { %1621 = vmatpush3.bf16.msra.mxu1 %v1129_v44  ;;  %1622 = vmatprep.mubr.msk.bf16.mxu1 %vm1672_vm0, %v1671_v3 }
  0xbd   : > { %1626 = vmatprep.subr.bf16.mxu1 %v1671_v3 }
  0xc0   : > { %1544 = vmatmul.mubr.msk.bf16.vlgmr.msra.gmra.mxu0 %vm277_vm3, %v1542_v42 }
  0xc1   : > { %1146 = vmatpush1.bf16.msra.mxu0 %v1123_v47  ;;  %1163 = vmatprep.mubr.bf16.mxu0 %v1673_v6 }
  0xc2   : > { %1551 = vmatprep.subr.msk.bf16.mxu0 %vm281_vm1, %v1243_v48 }
  0xc3   : > { %1623 = vmatmul.mubr.msk.bf16.vlgmr.msra.gmra.mxu1 %vm277_vm3, %v1546_v49 }
  0xc4   : > { %1627 = vmatpush3.bf16.msra.mxu1 %v1254_v51  ;;  %1628 = vmatprep.mubr.msk.bf16.mxu1 %vm1672_vm0, %v1671_v3 }
  0xc8   : > { %1548 = vmatmul.mubr.msk.bf16.vlgmr.msra.gmra.mxu0 %vm277_vm3, %v1546_v49 }
  0xc9   : > { %1271 = vmatpush1.bf16.msra.mxu0 %v1248_v52  ;;  %1288 = vmatprep.mubr.bf16.mxu0 %v1673_v6 }
  0xcb   : > { %1629 = vmatmul.mubr.msk.bf16.vlgmr.msra.gmra.mxu1 %vm277_vm3, %v1550_v53 }
  0xd0   : > { %1552 = vmatmul.mubr.msk.bf16.vlgmr.msra.gmra.mxu0 %vm277_vm3, %v1550_v53 }
 0x14b   : > { %v366_v54 = vpop.f32.mrf.mxu1 }
 0x14d   : > { %v1582_v55 = vpop.f32.mrf.mxu1 }
 0x14f   : > { %v369_v57 = vpop.f32.mrf.mxu1 }
 0x150   : > { %v325_v56 = vpop.f32.mrf.mxu0 }
 0x151   : > { %v1583_v59 = vpop.f32.mrf.mxu1 }
 0x152   : > { %v327_v58 = vpop.f32.mrf.mxu0 }
 0x153   : > { %v459_v60 = vpop.f32.mrf.mxu1 }
 0x154   : > { %v329_v3 = vpop.f32.mrf.mxu0  ;;  %v460_v41 = vadd.f32 %v459_v60, %v366_v54 }
 0x155   : > { %v1588_v62 = vpop.f32.mrf.mxu1 }
 0x156   : > { %v330_v61 = vpop.f32.mrf.mxu0 }
 0x157   : > { %v462_v6 = vpop.f32.mrf.mxu1 }
 0x158   : > { %v418_v63 = vpop.f32.mrf.mxu0 }
 0x159   : > { %v1589_v1 = vpop.f32.mrf.mxu1  ;;  %v419_v46 = vadd.f32 %v418_v63, %v325_v56  ;;  %v1368_v56 = vsub.s32 2, %v1723_v4 }
 0x15a   : > { %v420_v0 = vpop.f32.mrf.mxu0 }
 0x15b   : > { %v581_v5 = vpop.f32.mrf.mxu1  ;;  %v421_v50 = vadd.f32 %v420_v0, %v327_v58  ;;  %v1356_v0 = vld [vmem:[%s1903_s2] sm:$0x7] }
 0x15c   : > { %v422_v2 = vpop.f32.mrf.mxu0  ;;  %v589_v44 = vadd.f32 %v581_v5, %v460_v41 }
 0x15d   : > { %v1594_v8 = vpop.f32.mrf.mxu1 }
 0x15e   : > { %v423_v7 = vpop.f32.mrf.mxu0 }
 0x15f   : > { %v584_v10 = vpop.f32.mrf.mxu1  ;;  %v1360_v7 = vsub.s32 0, %v1723_v4 }
 0x160   : > { %v540_v9 = vpop.f32.mrf.mxu0 }
 0x161   : > { %v1595_v12 = vpop.f32.mrf.mxu1  ;;  %v587_v51 = vadd.f32 %v540_v9, %v419_v46 }
 0x162   : > { %v542_v11 = vpop.f32.mrf.mxu0 }
 0x163   : > { %v706_v14 = vpop.f32.mrf.mxu1  ;;  %v588_v57 = vadd.f32 %v542_v11, %v421_v50 }
 0x164   : > { %v544_v13 = vpop.f32.mrf.mxu0  ;;  %v714_v48 = vadd.f32 %v706_v14, %v589_v44 }
 0x165   : > { %v1600_v16 = vpop.f32.mrf.mxu1  ;;  %v1364_v13 = vsub.s32 1, %v1723_v4 }
 0x166   : > { %v545_v15 = vpop.f32.mrf.mxu0 }
 0x167   : > { %v709_v18 = vpop.f32.mrf.mxu1  ;;  %v1369_v15 = vrot.slane %v1356_v0, %v1368_v56 }
 0x168   : > { %v665_v17 = vpop.f32.mrf.mxu0 }
 0x169   : > { %v1601_v20 = vpop.f32.mrf.mxu1  ;;  %v712_v59 = vadd.f32 %v665_v17, %v587_v51 }
 0x16a   : > { %v667_v19 = vpop.f32.mrf.mxu0 }
 0x16b   : > { %v831_v22 = vpop.f32.mrf.mxu1  ;;  %v713_v54 = vadd.f32 %v667_v19, %v588_v57  ;;  %v1361_v19 = vrot.slane %v1356_v0, %v1360_v7 }
 0x16c   : > { %v669_v21 = vpop.f32.mrf.mxu0  ;;  %v839_v53 = vadd.f32 %v831_v22, %v714_v48 }
 0x16d   : > { %v1606_v24 = vpop.f32.mrf.mxu1 }
 0x16e   : > { %v670_v23 = vpop.f32.mrf.mxu0 }
 0x16f   : > { %v834_v26 = vpop.f32.mrf.mxu1 }
 0x170   : > { %v790_v25 = vpop.f32.mrf.mxu0 }
 0x171   : > { %v1607_v28 = vpop.f32.mrf.mxu1  ;;  %v837_v60 = vadd.f32 %v790_v25, %v712_v59  ;;  %v1365_v25 = vrot.slane %v1356_v0, %v1364_v13 }
 0x172   : > { %v792_v27 = vpop.f32.mrf.mxu0 }
 0x173   : > { %v956_v30 = vpop.f32.mrf.mxu1  ;;  %v838_v63 = vadd.f32 %v792_v27, %v713_v54 }
 0x174   : > { %v794_v29 = vpop.f32.mrf.mxu0  ;;  %v964_v61 = vadd.f32 %v956_v30, %v839_v53 }
 0x175   : > { %v1612_v32 = vpop.f32.mrf.mxu1 }
 0x176   : > { %v795_v31 = vpop.f32.mrf.mxu0 }
 0x177   : > { %v959_v34 = vpop.f32.mrf.mxu1 }
 0x178   : > { %v915_v33 = vpop.f32.mrf.mxu0 }
 0x179   : > { %v1613_v36 = vpop.f32.mrf.mxu1  ;;  %v962_v5 = vadd.f32 %v915_v33, %v837_v60 }
 0x17a   : > { %v917_v35 = vpop.f32.mrf.mxu0 }
 0x17b   : > { %v1081_v38 = vpop.f32.mrf.mxu1  ;;  %v963_v10 = vadd.f32 %v917_v35, %v838_v63 }
 0x17c   : > { %v919_v37 = vpop.f32.mrf.mxu0  ;;  %v1089_v1 = vadd.f32 %v1081_v38, %v964_v61 }
 0x17d   : > { %v1618_v40 = vpop.f32.mrf.mxu1 }
 0x17e   : > { %v920_v39 = vpop.f32.mrf.mxu0 }
 0x17f   : > { %v1084_v43 = vpop.f32.mrf.mxu1 }
 0x180   : > { %v1040_v42 = vpop.f32.mrf.mxu0 }
 0x181   : > { %v1619_v47 = vpop.f32.mrf.mxu1  ;;  %v1087_v11 = vadd.f32 %v1040_v42, %v962_v5 }
 0x182   : > { %v1042_v45 = vpop.f32.mrf.mxu0 }
 0x183   : > { %v1206_v52 = vpop.f32.mrf.mxu1  ;;  %v1088_v17 = vadd.f32 %v1042_v45, %v963_v10 }
 0x184   : > { %v1044_v49 = vpop.f32.mrf.mxu0  ;;  %v1214_v8 = vadd.f32 %v1206_v52, %v1089_v1 }
 0x185   : > { %v1624_v3 = vpop.f32.mrf.mxu1 }
 0x186   : > { %v1045_v55 = vpop.f32.mrf.mxu0 }
 0x187   : > { %v1209_v6 = vpop.f32.mrf.mxu1 }
 0x188   : > { %v1165_v62 = vpop.f32.mrf.mxu0 }
 0x189   : > { %v1625_v58 = vpop.f32.mrf.mxu1  ;;  %v1212_v18 = vadd.f32 %v1165_v62, %v1087_v11 }
 0x18a   : > { %v1167_v2 = vpop.f32.mrf.mxu0 }
 0x18b   : > { %v1331_v12 = vpop.f32.mrf.mxu1  ;;  %v1213_v23 = vadd.f32 %v1167_v2, %v1088_v17 }
 0x18c   : > { %v1169_v9 = vpop.f32.mrf.mxu0  ;;  %v1339_v14 = vadd.f32 %v1331_v12, %v1214_v8 }
 0x18d   : > { %v1630_v20 = vpop.f32.mrf.mxu1 }
 0x18e   : > { %v1170_v16 = vpop.f32.mrf.mxu0  ;;  %v1559_v21 = vpack.c.bf16 %v1339_v14, %v1339_v14  ;;  %v1375_v27 = vmul.f32 %v1369_v15, %v1339_v14 }
 0x18f   : > { %v1334_v26 = vpop.f32.mrf.mxu1 }
 0x190   : > { %v1290_v22 = vpop.f32.mrf.mxu0  ;;  %1355 = vst.msk [vmem:[%s237_s7 + $0x8] sm:$0xf] %vm1354_vm11, %v1559_v21  ;;  %v1386_v35 = vmul.f32 %v1375_v27, %v1375_v27  ;;  %v1378_v39 = vsel %vm1377_vm12, %v1375_v27, 0.0 }
 0x191   : > { %v1337_v24 = vadd.f32 %v1290_v22, %v1212_v18  ;;  %v1631_v30 = vpop.f32.mrf.mxu1 }
 0x192   : > { %v1292_v4 = vpop.f32.mrf.mxu0  ;;  %v1388_v42 = vsel %vm1377_vm12, %v1386_v35, 0.0 }
 0x193   : > { %v1373_v28 = vmul.f32 %v1361_v19, %v1337_v24  ;;  %v1338_v29 = vadd.f32 %v1292_v4, %v1213_v23 }
 0x194   : > { %v1294_v31 = vpop.f32.mrf.mxu0 }
 0x195   : > { %v1558_v32 = vpack.c.bf16 %v1338_v29, %v1337_v24  ;;  %v1374_v33 = vmul.f32 %v1365_v25, %v1338_v29  ;;  %v1384_v36 = vmul.f32 %v1373_v28, %v1373_v28 }
 0x196   : > { %v1295_v34 = vpop.f32.mrf.mxu0 }
 0x197   : > { %1353 = vst [vmem:[%s237_s7] sm:$0xff] %v1558_v32  ;;  %v1385_v37 = vmul.f32 %v1374_v33, %v1374_v33  ;;  %v1376_v38 = vadd.f32 %v1374_v33, %v1373_v28 }
 0x199   : > { %v1379_v40 = vadd.f32 %v1378_v39, %v1376_v38  ;;  %v1387_v41 = vadd.f32 %v1385_v37, %v1384_v36 }
 0x19b   : > { %1380 = vadd.xlane.f32.xlu0 %v1379_v40  ;;  %v1389_v43 = vadd.f32 %v1388_v42, %v1387_v41 }
 0x19d   : > { %1390 = vadd.xlane.f32.xlu1 %v1389_v43 }
 0x224   : > { %v1381_v44 = vpop.xlane.xlu0 %1380 }
 0x225   : > { %1383 = vst.msk [vmem:[%s241_s11] sm:$0xff] %vm1382_vm13, %v1381_v44 }
 0x226   : > { %v1391_v45 = vpop.xlane.xlu1 %1390 }
 0x227   : > { %1392 = vst.msk [vmem:[%s245_s14] sm:$0xff] %vm1382_vm13, %v1391_v45 }
 0x228 PF: > { %s16_s18 = sadd.s32 1, %s1668_s18  }
 0x229   : > { %p13_p4 = scmp.ge.s32.totalorder %s16_s18, 4  }
 0x22b   :  { %15 = sbr.rel (!%p13_p4) target bundleno = 1 (0x1), region = 94 }

</bundles_post_ra>
